<compile_context>
chip_gen: v7x
topology: tpu7x:2x2x1
jax: 0.10.0
libtpu: 0.0.40
codegen_flags: <defaults>
</compile_context>

<pallas_src>
import functools

import jax
import jax.numpy as jnp
from jax import lax
from jax.experimental import pallas as pl
from jax.experimental.pallas import tpu as pltpu


def _round_up(x, m):
    return (x + m - 1) // m * m


# ---------------------------------------------------------------------------
# Stage 1: fused QKV projection, computed once per (batch, row-tile).
# ---------------------------------------------------------------------------
def _proj_kernel(x_ref, w_ref, b_ref, q_ref, k_ref, v_ref, *, ep, ek):
    qkv = jnp.dot(x_ref[...], w_ref[...],
                  preferred_element_type=jnp.float32) + b_ref[...]
    # Splits fall on 128-lane boundaries (ep, ek are multiples of 128).
    q_ref[...] = qkv[:, :ep].astype(q_ref.dtype)
    k_ref[...] = qkv[:, ep:ep + ek].astype(k_ref.dtype)
    v_ref[...] = qkv[:, ep + ek:].astype(v_ref.dtype)


# ---------------------------------------------------------------------------
# Stage 2: flash attention + fused output projection.
# Grid = (batch, q-tile, kv-tile); kv-tile is the "arbitrary" reduction axis.
# ---------------------------------------------------------------------------
def _attn_kernel(q_ref, k_ref, v_ref, wo_ref, bo_ref, o_ref,
                 m_sc, l_sc, acc_sc,
                 *, ones_col, seq_len, needs_mask, fuse_rowsum):
    ki = pl.program_id(2)
    nk = pl.num_programs(2)

    @pl.when(ki == 0)
    def _init():
        m_sc[...] = jnp.full(m_sc.shape, -jnp.inf, dtype=m_sc.dtype)
        acc_sc[...] = jnp.zeros(acc_sc.shape, dtype=acc_sc.dtype)
        if not fuse_rowsum:
            l_sc[...] = jnp.zeros(l_sc.shape, dtype=l_sc.dtype)

    q = q_ref[...]                                  # (tq, Ep)   compute dtype
    k = k_ref[...]                                  # (tk, Ek)
    v = v_ref[...]                                  # (tk, Ev)   col `ones_col`==1

    # Scores: contract the feature axis of both q and k (no k.T materialized).
    s = lax.dot_general(q, k, dimension_numbers=(((1,), (1,)), ((), ())),
                        preferred_element_type=jnp.float32)        # (tq, tk)
    # NOTE: no 1/sqrt(d) scaling -- the PyTorch module uses raw Q K^T.

    if needs_mask:
        # Sequence was padded up to a tile multiple; mask out the padded keys.
        tk = k.shape[0]
        key_idx = ki * tk + lax.broadcasted_iota(jnp.int32, s.shape, 1)
        s = jnp.where(key_idx < seq_len, s, -jnp.inf)

    # Online (flash) softmax update, all in f32.  When `fuse_rowsum`, the
    # denominator rides in V's spare "ones" lane so the row-sum happens on the
    # MXU inside the p @ V dot instead of a separate VPU/XLU reduction.
    m_prev = m_sc[...]
    m_new = jnp.maximum(m_prev, jnp.max(s, axis=-1, keepdims=True))
    alpha = jnp.exp(m_prev - m_new)
    p = jnp.exp(s - m_new)
    if not fuse_rowsum:
        l_sc[...] = alpha * l_sc[...] + jnp.sum(p, axis=-1, keepdims=True)
    acc_sc[...] = alpha * acc_sc[...] + jnp.dot(
        p.astype(v.dtype), v, preferred_element_type=jnp.float32)
    m_sc[...] = m_new

    @pl.when(ki == nk - 1)
    def _finalize():
        acc = acc_sc[...]
        if fuse_rowsum:
            l = acc[:, ones_col:ones_col + 1]        # MXU-accumulated row sum
        else:
            l = l_sc[...]
        attn = acc * (1.0 / l)                       # exact; once per q-tile
        out = jnp.dot(attn.astype(wo_ref.dtype), wo_ref[...],
                      preferred_element_type=jnp.float32) + bo_ref[...]
        o_ref[...] = out.astype(o_ref.dtype)         # lane-dense (Dp % 128 == 0)


def self_attention(x, params, *, compute_dtype=jnp.bfloat16,
                   q_tile=512, kv_tile=1024, out_dtype=None):
    """x: (B, S, Din).  params: wq/bq/wk/bk/wv/bv/wo/bo with weights (in, out)."""
    B, S, Din = x.shape
    Dout = params["wq"].shape[1]
    cd = jnp.dtype(compute_dtype)
    out_dtype = x.dtype if out_dtype is None else out_dtype   # pass bf16 to halve writeback
    f32 = jnp.float32

    # ---- lane-aligned (128-multiple) feature dims --------------------------
    Dp = _round_up(Din, 128)            # model dim (x and output)
    Ep = _round_up(Dout, 128)           # Q / K feature dim
    Ek = Ep
    Ev = Ep                             # V feature dim (padded)
    fuse_rowsum = Ep > Dout             # spare padding lane available for "ones"
    ones_col = Dout if fuse_rowsum else 0
    Etot = Ep + Ek + Ev

    # ---- sequence tiling ----------------------------------------------------
    sub = 16 if cd.itemsize == 2 else 8          # bf16 packs 16 rows / sublane
    q_tile = _round_up(q_tile, sub)
    kv_tile = _round_up(kv_tile, sub)
    tk = min(kv_tile, _round_up(S, sub))
    tq = min(q_tile, tk)
    tk = (tk // tq) * tq                # tq divides tk -> one padded length
    Sp = _round_up(S, tk)
    nq, nk = Sp // tq, Sp // tk
    needs_mask = Sp != S

    # ---- pad & pack parameters (done per call; hoist for hot paths) --------
    wqkv = jnp.zeros((Dp, Etot), f32)
    wqkv = wqkv.at[:Din, :Dout].set(params["wq"].astype(f32))
    wqkv = wqkv.at[:Din, Ep:Ep + Dout].set(params["wk"].astype(f32))
    wqkv = wqkv.at[:Din, Ep + Ek:Ep + Ek + Dout].set(params["wv"].astype(f32))
    bqkv = jnp.zeros((1, Etot), f32)
    bqkv = bqkv.at[0, :Dout].set(params["bq"].astype(f32))
    bqkv = bqkv.at[0, Ep:Ep + Dout].set(params["bk"].astype(f32))
    bqkv = bqkv.at[0, Ep + Ek:Ep + Ek + Dout].set(params["bv"].astype(f32))
    if fuse_rowsum:
        bqkv = bqkv.at[0, Ep + Ek + ones_col].set(1.0)   # "ones" lane of V
    wo = jnp.zeros((Ev, Dp), f32).at[:Dout, :Din].set(params["wo"].astype(f32))
    bo = jnp.zeros((1, Dp), f32).at[0, :Din].set(params["bo"].astype(f32))

    xw = jnp.pad(x, ((0, 0), (0, Sp - S), (0, Dp - Din))).astype(cd)
    wqkv_c = wqkv.astype(cd)
    wo_c = wo.astype(cd)
    # Biases stay f32: added after the f32-accumulated matmul.

    vmem_limit = 64 * 1024 * 1024

    # ---- stage 1: QKV projection -------------------------------------------
    q_p, k_p, v_p = pl.pallas_call(
        functools.partial(_proj_kernel, ep=Ep, ek=Ek),
        out_shape=(jax.ShapeDtypeStruct((B, Sp, Ep), cd),
                   jax.ShapeDtypeStruct((B, Sp, Ek), cd),
                   jax.ShapeDtypeStruct((B, Sp, Ev), cd)),
        grid_spec=pltpu.PrefetchScalarGridSpec(
            num_scalar_prefetch=0,
            grid=(B, nq),
            in_specs=[
                pl.BlockSpec((pl.Squeezed(), tq, Dp), lambda b, i: (b, i, 0)),
                pl.BlockSpec((Dp, Etot), lambda b, i: (0, 0)),     # fused W
                pl.BlockSpec((1, Etot), lambda b, i: (0, 0)),      # fused bias
            ],
            out_specs=[
                pl.BlockSpec((pl.Squeezed(), tq, Ep), lambda b, i: (b, i, 0)),
                pl.BlockSpec((pl.Squeezed(), tq, Ek), lambda b, i: (b, i, 0)),
                pl.BlockSpec((pl.Squeezed(), tq, Ev), lambda b, i: (b, i, 0)),
            ],
        ),
        compiler_params=pltpu.CompilerParams(
            dimension_semantics=("parallel", "parallel"),
            vmem_limit_bytes=vmem_limit),
    )(xw, wqkv_c, bqkv)

    # ---- stage 2: flash attention + fused output projection ----------------
    out = pl.pallas_call(
        functools.partial(_attn_kernel, ones_col=ones_col, seq_len=S,
                          needs_mask=needs_mask, fuse_rowsum=fuse_rowsum),
        out_shape=jax.ShapeDtypeStruct((B, Sp, Dp), out_dtype),
        grid_spec=pltpu.PrefetchScalarGridSpec(
            num_scalar_prefetch=0,
            grid=(B, nq, nk),
            in_specs=[
                pl.BlockSpec((pl.Squeezed(), tq, Ep), lambda b, qi, ki: (b, qi, 0)),
                pl.BlockSpec((pl.Squeezed(), tk, Ek), lambda b, qi, ki: (b, ki, 0)),
                pl.BlockSpec((pl.Squeezed(), tk, Ev), lambda b, qi, ki: (b, ki, 0)),
                pl.BlockSpec((Ev, Dp), lambda b, qi, ki: (0, 0)),   # wo
                pl.BlockSpec((1, Dp), lambda b, qi, ki: (0, 0)),    # bo
            ],
            out_specs=pl.BlockSpec((pl.Squeezed(), tq, Dp),
                                   lambda b, qi, ki: (b, qi, 0)),
            scratch_shapes=[
                pltpu.VMEM((tq, 1), jnp.float32),   # running max m
                pltpu.VMEM((tq, 1), jnp.float32),   # running denom l (unfused path)
                pltpu.VMEM((tq, Ev), jnp.float32),  # output (+ row-sum) accumulator
            ],
        ),
        compiler_params=pltpu.CompilerParams(
            dimension_semantics=("parallel", "parallel", "arbitrary"),
            vmem_limit_bytes=vmem_limit),
    )(q_p, k_p, v_p, wo_c, bo)

    return out[:, :S, :Din]


# ---------------------------------------------------------------------------
# Reference, init, and self-test.
# ---------------------------------------------------------------------------
def init_params(key, input_dim, output_dim):
    """Deterministic init mimicking nn.Linear's uniform(-1/sqrt(fan_in), ...)."""
    ks = jax.random.split(key, 8)

    def lin(kw, kb, fan_in, fan_out):
        bound = 1.0 / jnp.sqrt(fan_in)
        w = jax.random.uniform(kw, (fan_in, fan_out), jnp.float32, -bound, bound)
        b = jax.random.uniform(kb, (fan_out,), jnp.float32, -bound, bound)
        return w, b

    wq, bq = lin(ks[0], ks[1], input_dim, output_dim)
    wk, bk = lin(ks[2], ks[3], input_dim, output_dim)
    wv, bv = lin(ks[4], ks[5], input_dim, output_dim)
    wo, bo = lin(ks[6], ks[7], output_dim, input_dim)
    return dict(wq=wq, bq=bq, wk=wk, bk=bk, wv=wv, bv=bv, wo=wo, bo=bo)


def self_attention_ref(x, p):
    q = x @ p["wq"] + p["bq"]
    k = x @ p["wk"] + p["bk"]
    v = x @ p["wv"] + p["bv"]
    s = jnp.einsum("bqd,bkd->bqk", q, k)
    a = jax.nn.softmax(s, axis=-1)
    wv = jnp.einsum("bqk,bkd->bqd", a, v)
    return wv @ p["wo"] + p["bo"]


if __name__ == "__main__":
    key = jax.random.PRNGKey(0)
    kx, kp = jax.random.split(key)

    # Config 1: small dims (exercises Din/Dout padding + MXU-fused row-sum).
    B, S, input_dim, output_dim = 2, 8, 32, 16
    x = jax.random.normal(kx, (B, S, input_dim), jnp.float32)
    params = init_params(kp, input_dim, output_dim)
    ref = self_attention_ref(x, params)

    out_f32 = jax.block_until_ready(
        self_attention(x, params, compute_dtype=jnp.float32))
    assert out_f32.shape == (B, S, input_dim)
    assert jnp.allclose(out_f32, ref, atol=5e-3, rtol=5e-3), "f32 mismatch vs reference"

    out_bf16 = jax.block_until_ready(self_attention(x, params))   # default bf16 path
    assert out_bf16.shape == (B, S, input_dim)
    assert jnp.allclose(out_bf16, ref, atol=5e-2, rtol=5e-2), "bf16 mismatch vs reference"

    # Config 2: Dout already a multiple of 128 (exercises the separate-l path).
    params2 = init_params(jax.random.fold_in(kp, 1), input_dim, 128)
    ref2 = self_attention_ref(x, params2)
    out2 = jax.block_until_ready(
        self_attention(x, params2, compute_dtype=jnp.float32))
    assert jnp.allclose(out2, ref2, atol=5e-3, rtol=5e-3), "Dout=128 mismatch vs reference"

    print("KERNEL_OK")
</pallas_src>

<mosaic_0001>
module attributes {stable_mosaic.version = 11 : i64} {
  func.func @_proj_kernel(%arg0: i32, %arg1: i32, %arg2: memref<1x8x128xf32, #tpu.memory_space<vmem>>, %arg3: memref<128x384xf32, #tpu.memory_space<vmem>>, %arg4: memref<1x384xf32, #tpu.memory_space<vmem>>, %arg5: memref<1x8x128xf32, #tpu.memory_space<vmem>>, %arg6: memref<1x8x128xf32, #tpu.memory_space<vmem>>, %arg7: memref<1x8x128xf32, #tpu.memory_space<vmem>>) attributes {dimension_semantics = [#tpu.dimension_semantics<parallel>, #tpu.dimension_semantics<parallel>], iteration_bounds = array<i64: 2, 1>, scalar_prefetch = 0 : i64, scratch_operands = 0 : i64, tpu.core_type = #tpu.core_type<tc>, window_params = [{transform_indices = @transform_0, window_bounds = array<i64: 1, 8, 128>}, {pipeline_mode = #tpu.pipeline_mode<synchronous>, transform_indices = @transform_1, window_bounds = array<i64: 128, 384>}, {pipeline_mode = #tpu.pipeline_mode<synchronous>, transform_indices = @transform_2, window_bounds = array<i64: 1, 384>}, {transform_indices = @transform_3, window_bounds = array<i64: 1, 8, 128>}, {transform_indices = @transform_4, window_bounds = array<i64: 1, 8, 128>}, {transform_indices = @transform_5, window_bounds = array<i64: 1, 8, 128>}]} {
    %c0 = arith.constant 0 : index
    %c0_0 = arith.constant 0 : index
    %c0_1 = arith.constant 0 : index
    %0 = vector.load %arg2[%c0, %c0_0, %c0_1] : memref<1x8x128xf32, #tpu.memory_space<vmem>>, vector<1x8x128xf32>
    %1 = vector.shape_cast %0 : vector<1x8x128xf32> to vector<8x128xf32>
    %c0_2 = arith.constant 0 : index
    %c0_3 = arith.constant 0 : index
    %2 = vector.load %arg3[%c0_2, %c0_3] : memref<128x384xf32, #tpu.memory_space<vmem>>, vector<128x384xf32>
    %cst = arith.constant dense<0.000000e+00> : vector<8x384xf32>
    %3 = tpu.matmul %1, %2, %cst {dimension_numbers = #tpu.dot_dimension_numbers<[1], [0], [0], [1], [0, 0, 1, 1], [], []>} : vector<8x128xf32>, vector<128x384xf32>, vector<8x384xf32> -> vector<8x384xf32>
    %c0_4 = arith.constant 0 : index
    %c0_5 = arith.constant 0 : index
    %4 = vector.load %arg4[%c0_4, %c0_5] : memref<1x384xf32, #tpu.memory_space<vmem>>, vector<1x384xf32>
    %5 = vector.broadcast %4 : vector<1x384xf32> to vector<8x384xf32>
    %6 = arith.addf %3, %5 : vector<8x384xf32>
    %7 = vector.extract_strided_slice %6 {offsets = [0, 0], sizes = [8, 128], strides = [1, 1]} : vector<8x384xf32> to vector<8x128xf32>
    %c0_6 = arith.constant 0 : index
    %c0_7 = arith.constant 0 : index
    %c0_8 = arith.constant 0 : index
    %8 = vector.load %arg5[%c0_6, %c0_7, %c0_8] : memref<1x8x128xf32, #tpu.memory_space<vmem>>, vector<1x8x128xf32>
    %9 = vector.shape_cast %8 : vector<1x8x128xf32> to vector<8x128xf32>
    %10 = vector.shape_cast %7 : vector<8x128xf32> to vector<1x8x128xf32>
    tpu.vector_store %arg5[%c0_6, %c0_7, %c0_8], %10 {strides = array<i32>} : memref<1x8x128xf32, #tpu.memory_space<vmem>>, vector<1x8x128xf32>,
    %11 = vector.extract_strided_slice %6 {offsets = [0, 128], sizes = [8, 128], strides = [1, 1]} : vector<8x384xf32> to vector<8x128xf32>
    %c0_9 = arith.constant 0 : index
    %c0_10 = arith.constant 0 : index
    %c0_11 = arith.constant 0 : index
    %12 = vector.load %arg6[%c0_9, %c0_10, %c0_11] : memref<1x8x128xf32, #tpu.memory_space<vmem>>, vector<1x8x128xf32>
    %13 = vector.shape_cast %12 : vector<1x8x128xf32> to vector<8x128xf32>
    %14 = vector.shape_cast %11 : vector<8x128xf32> to vector<1x8x128xf32>
    tpu.vector_store %arg6[%c0_9, %c0_10, %c0_11], %14 {strides = array<i32>} : memref<1x8x128xf32, #tpu.memory_space<vmem>>, vector<1x8x128xf32>,
    %15 = vector.extract_strided_slice %6 {offsets = [0, 256], sizes = [8, 128], strides = [1, 1]} : vector<8x384xf32> to vector<8x128xf32>
    %c0_12 = arith.constant 0 : index
    %c0_13 = arith.constant 0 : index
    %c0_14 = arith.constant 0 : index
    %16 = vector.load %arg7[%c0_12, %c0_13, %c0_14] : memref<1x8x128xf32, #tpu.memory_space<vmem>>, vector<1x8x128xf32>
    %17 = vector.shape_cast %16 : vector<1x8x128xf32> to vector<8x128xf32>
    %18 = vector.shape_cast %15 : vector<8x128xf32> to vector<1x8x128xf32>
    tpu.vector_store %arg7[%c0_12, %c0_13, %c0_14], %18 {strides = array<i32>} : memref<1x8x128xf32, #tpu.memory_space<vmem>>, vector<1x8x128xf32>,
    return
  }
  func.func @transform_0(%arg0: i32, %arg1: i32) -> (i32, i32, i32) {
    %c0_i32 = arith.constant 0 : i32
    %c0_i32_0 = arith.constant 0 : i32
    return %arg0, %arg1, %c0_i32 : i32, i32, i32
  }
  func.func @transform_1(%arg0: i32, %arg1: i32) -> (i32, i32) {
    %c0_i32 = arith.constant 0 : i32
    %c0_i32_0 = arith.constant 0 : i32
    %c0_i32_1 = arith.constant 0 : i32
    return %c0_i32, %c0_i32_0 : i32, i32
  }
  func.func @transform_2(%arg0: i32, %arg1: i32) -> (i32, i32) {
    %c0_i32 = arith.constant 0 : i32
    %c0_i32_0 = arith.constant 0 : i32
    %c0_i32_1 = arith.constant 0 : i32
    return %c0_i32, %c0_i32_0 : i32, i32
  }
  func.func @transform_3(%arg0: i32, %arg1: i32) -> (i32, i32, i32) {
    %c0_i32 = arith.constant 0 : i32
    %c0_i32_0 = arith.constant 0 : i32
    return %arg0, %arg1, %c0_i32 : i32, i32, i32
  }
  func.func @transform_4(%arg0: i32, %arg1: i32) -> (i32, i32, i32) {
    %c0_i32 = arith.constant 0 : i32
    %c0_i32_0 = arith.constant 0 : i32
    return %arg0, %arg1, %c0_i32 : i32, i32, i32
  }
  func.func @transform_5(%arg0: i32, %arg1: i32) -> (i32, i32, i32) {
    %c0_i32 = arith.constant 0 : i32
    %c0_i32_0 = arith.constant 0 : i32
    return %arg0, %arg1, %c0_i32 : i32, i32, i32
  }
}

</mosaic_0001>

<bundles_post_ra>
// kernel: tpu_custom_call.1
= control target key start
LH: loop header
LB: loop body
LE: loop exit
PB: predicated region body
PF: predicated region fallthrough
CT: control target
= control target key end

     0   :  { %s1565_s0 = inlined_call_operand.hbm [shape: f32[2,8,128], index: 0, kind: input, shape index: {}]   ;;  %s1566_s1 = inlined_call_operand.hbm [shape: f32[128,384], index: 1, kind: input, shape index: {}]   ;;  %s1567_s2 = inlined_call_operand.hbm [shape: f32[1,384], index: 2, kind: input, shape index: {}]   ;;  %s1568_s3 = inlined_call_operand.hbm [shape: f32[2,8,128], index: 3, kind: output, shape index: {0}]   ;;  %s1569_s4 = inlined_call_operand.hbm [shape: f32[2,8,128], index: 4, kind: output, shape index: {1}]   ;;  %s1570_s5 = inlined_call_operand.hbm [shape: f32[2,8,128], index: 5, kind: output, shape index: {2}]  }
   0x1   :  { %1575 = sst [smem:[#allocation16_spill]] %s1565_s0 }
   0x2   :  { %1576 = sst [smem:[#allocation17_spill]] %s1566_s1 }
   0x3   :  { %1577 = sst [smem:[#allocation18_spill]] %s1567_s2 }
   0x4   :  { %11 = vsyncpa [#allocation3], 0 }
   0x5   :  { %13 = vsyncpa [#allocation3 + $0x1], 0 }
   0x6   :  { %14 = vsyncpa [#allocation6], 0 }
   0x7   :  { %15 = vsyncpa [#allocation4], 0 }
   0x8   :  { %17 = vsyncpa [#allocation4 + $0x1], 0 }
   0x9   :  { %18 = vsyncpa [#allocation10], 0 }
   0xa   :  { %20 = vsyncpa [#allocation10 + $0x1], 0  ;;  %s1235_s18 = smov 0   ;;  %s1237_s19 = smov 0  }
   0xb   :  { %s1239_s20 = smov 0   ;;  %s1241_s21 = smov 0  }
   0xc   :  { %s1243_s22 = smov 0   ;;  %s1245_s23 = smov 0  }
   0xd LB: > { %s1266_s24 = sadd.s32 4294967295, %s1192_s23   ;;  %s1574_s25 = sadd.s32 4294967294, %s1192_s23   ;;  %s1192_s23 = sphi %s1245_s23, %s26_s23   ;;  %s1188_s22 = sphi %s1243_s22, %s1600_s22   ;;  %s1184_s21 = sphi %s1241_s21, %s1599_s21   ;;  %s1180_s20 = sphi %s1239_s20, %s1598_s20   ;;  %s1176_s19 = sphi %s1237_s19, %s1597_s19   ;;  %s1172_s18 = sphi %s1235_s18, %s1596_s18  }
   0xe   : > { %p60_p0 = scmp.ne.s32.totalorder %s1176_s19, %s1172_s18  ;;  %p1571_p1 = scmp.eq.s32.totalorder %s1266_s24, 0 }
   0xf   : > { %p134_p3 = scmp.eq.s32.totalorder %s1574_s25, 1  ;;  %p733_p5 = scmp.ge.s32.totalorder %s1192_s23, 1 }
  0x10   : > { %p1277_p4 = por %p1571_p1, %p60_p0  ;;  %p197_p7 = scmp.lt.s32.totalorder %s1192_s23, 3 }
  0x11   : > { %p1282_p6 = por %p134_p3, %p60_p0  ;;  %s1194_s29 = smov [#allocation5]  }
  0x12   : > { %s1578_s26 = scalar_select %p1277_p4, 1, 0 }
  0x13   : > { %s1579_s27 = scalar_select %p1282_p6, 1, 0 }
  0x14   : > { %p1287_p8 = pnand %p733_p5, %p197_p7  ;;  %s209_s30 = sshll.u32 %s1194_s29, 4  ;;  %s1291_s30 = int_to_ptr.vmem [resolvable:$true] %s209_s30 }
  0x15   : > { %s1195_s7 = smov [#allocation7]   ;;  %s1582_s1 = sld [smem:[#allocation17_spill]] }
  0x16   : > { %p878_p9 = pneg %p1287_p8  ;;  %s223_s8 = sshll.u32 %s1195_s7, 4  ;;  %s1302_s8 = int_to_ptr.vmem [resolvable:$true] %s223_s8 }
  0x18   : > { %p1298_p11 = pnand %p878_p9, %p1571_p1 }
  0x1a   : > { %p962_p13 = pneg %p1298_p11 }
  0x1b   : > { %s960_s11 = scalar_lea.hbm %s1582_s1, 6144 }
  0x1c   : > { %p961_p12 = scmp.ne.s32.totalorder %s1582_s1, %s960_s11  ;;  %p967_p5 = scmp.lt.u32.totalorder %s960_s11, %s1582_s1 }
  0x1e   : > { %p963_p0 = pnand %p962_p13, %p961_p12 }
  0x20   : > { %p964_p3 = pneg %p963_p0 }
  0x22   : > { %p969_p7 = pnand %p967_p5, %p964_p3 }
  0x24   : > { %972 = shalt.err (!%p969_p7)
}
  0x25   : > { %s973_s16 = scalar_lea.vmem %s1291_s30, 6144  ;;  %p981_p2 = scmp.lt.s32.totalorder %s1291_s30, %s1291_s30 }
  0x26   : > { %p974_p9 = scmp.ne.s32.totalorder %s1291_s30, %s973_s16  ;;  %p982_p12 = scmp.lt.s32.totalorder %s973_s16, %s973_s16 }
  0x28   : > { %p976_p10 = pnand %p974_p9, %p962_p13  ;;  %p983_p0 = por %p982_p12, %p981_p2 }
  0x2a   : > { %p977_p1 = pneg %p976_p10 }
  0x2c   : > { %p984_p6 = pnand %p983_p0, %p977_p1 }
  0x2e   : > { %987 = shalt.err (!%p984_p6)
}
  0x2f   : > { %s1196_s17 = smov 384   ;;  %s1197_s29 = smov 24  }
  0x30   : > { %881 = dma.hbm_to_vmem [thread:$0]  (!%p1298_p11), %s1582_s1, 6144, %s1291_s30, [#allocation6], %s1196_s17, %s1196_s17, %s1197_s29  }
  0x31   : > { %s1583_s2 = sld [smem:[#allocation18_spill]] }
  0x37   : > { %s988_s12 = scalar_lea.hbm %s1583_s2, 48 }
  0x38   : > { %p989_p2 = scmp.ne.s32.totalorder %s1583_s2, %s988_s12  ;;  %p995_p10 = scmp.lt.u32.totalorder %s988_s12, %s1583_s2 }
  0x3a   : > { %p991_p1 = pnand %p989_p2, %p962_p13 }
  0x3c   : > { %p992_p6 = pneg %p991_p1 }
  0x3e   : > { %p997_p3 = pnand %p995_p10, %p992_p6 }
  0x40   : > { %1000 = shalt.err (!%p997_p3)
}
  0x41   : > { %s1001_s30 = scalar_lea.vmem %s1302_s8, 48  ;;  %s1008_s17 = scalar_lea.vmem %s1302_s8, 64 }
  0x42   : > { %p1002_p5 = scmp.ne.s32.totalorder %s1302_s8, %s1001_s30  ;;  %p1009_p12 = scmp.lt.s32.totalorder %s1302_s8, %s1302_s8 }
  0x43   : > { %p1010_p0 = scmp.lt.s32.totalorder %s1008_s17, %s1001_s30 }
  0x44   : > { %p1004_p7 = pnand %p1002_p5, %p962_p13 }
  0x45   : > { %p1011_p2 = por %p1010_p0, %p1009_p12 }
  0x46   : > { %p1005_p9 = pneg %p1004_p7 }
  0x48   : > { %p1012_p1 = pnand %p1011_p2, %p1005_p9 }
  0x4a   : > { %1015 = shalt.err (!%p1012_p1)
}
  0x4b   : > { %884 = dma.hbm_to_vmem [thread:$0]  (!%p1298_p11), %s1583_s2, 48, %s1302_s8, [#allocation6]  }
  0x4c   : > { %s38_s9 = sadd.s32 1, %s1188_s22  ;;  %s47_s10 = sadd.s32 1, %s1180_s20 }
  0x4d   : > { %p40_p13 = scmp.ge.s32.totalorder %s38_s9, 2  ;;  %p54_p6 = scmp.ne.s32.totalorder %s1180_s20, %s1176_s19 }
  0x4e   : > { %p55_p10 = scmp.eq.s32.totalorder %s1192_s23, 0  ;;  %p901_p3 = scmp.lt.s32.totalorder %s1192_s23, 2 }
  0x4f   : > { %s1602_s9 = smov (%p40_p13, %s38_s9), 0  ;;  %p1584_p7 = scmp.eq.s32.totalorder %s1266_s24, 1 }
  0x50   : > { %p56_p5 = por %p55_p10, %p54_p6  ;;  %s42_s11 = ssub.s32 %s1188_s22, %s1602_s9 }
  0x51   : > { %p1367_p9 = por %p1584_p7, %p54_p6  ;;  %s234_s12 = sand.u32 1, %s1180_s20  }
  0x52   : > { %p45_p12 = scmp.eq.s32.totalorder %s42_s11, 0  ;;  %s737_s8 = sshll.u32 %s234_s12, 3 }
  0x53   : > { %s1585_s6 = scalar_select %p1367_p9, 1, 0 }
  0x54   : > { %s738_s13 = sshll.u32 %s1188_s22, 7  ;;  %s1586_s0 = sld [smem:[#allocation16_spill]] }
  0x55   : > { %s1376_s14 = scalar_select %p45_p12, %s1180_s20, %s47_s10  }
  0x56   : > { %s238_s17 = scalar_lea.vmem [#allocation2], %s737_s8  ;;  %p1385_p11 = pnand %p901_p3, %p56_p5 }
  0x57   : > { %s246_s29 = sshll.u32 %s238_s17, 4  ;;  %s235_s10 = scalar_lea.sflag [#allocation3], %s234_s12  ;;  %s1389_s29 = int_to_ptr.vmem [resolvable:$true] %s246_s29 }
  0x58   : > { %p1018_p2 = pneg %p1385_p11 }
  0x5a   : > { %s1381_s30 = scalar_lea.hbm %s1586_s0, %s738_s13  ;;  %s1021_s15 = scalar_lea.hbm %s1586_s0, 256 }
  0x5b   : > { %s1016_s11 = scalar_lea.hbm %s1381_s30, 128  ;;  %p1022_p6 = scmp.lt.u32.totalorder %s1381_s30, %s1586_s0 }
  0x5c   : > { %p1017_p0 = scmp.ne.s32.totalorder %s1381_s30, %s1016_s11  ;;  %p1023_p10 = scmp.lt.u32.totalorder %s1021_s15, %s1016_s11 }
  0x5d   : > { %p1025_p5 = scmp.lt.u32.totalorder %s1016_s11, %s1381_s30 }
  0x5e   : > { %p1019_p1 = pnand %p1018_p2, %p1017_p0  ;;  %p1024_p3 = por %p1023_p10, %p1022_p6 }
  0x60   : > { %p1020_p13 = pneg %p1019_p1  ;;  %p1026_p7 = por %p1025_p5, %p1024_p3 }
  0x62   : > { %p1027_p12 = pnand %p1026_p7, %p1020_p13 }
  0x64   : > { %1030 = shalt.err (!%p1027_p12)
}
  0x65   : > { %s1031_s12 = scalar_lea.vmem %s1389_s29, 128  ;;  %s1198_s8 = smov [#allocation2]  }
  0x66   : > { %p1032_p0 = scmp.ne.s32.totalorder %s1389_s29, %s1031_s12  ;;  %s1036_s13 = sshll.u32 %s1198_s8, 4  ;;  %s1037_s13 = int_to_ptr.vmem [resolvable:$false] %s1036_s13 }
  0x67   : > { %s1038_s16 = scalar_lea.vmem %s1037_s13, 256  ;;  %p1039_p4 = scmp.lt.s32.totalorder %s1389_s29, %s1037_s13 }
  0x68   : > { %p1034_p1 = pnand %p1032_p0, %p1018_p2  ;;  %p1040_p6 = scmp.lt.s32.totalorder %s1038_s16, %s1031_s12 }
  0x6a   : > { %p1035_p9 = pneg %p1034_p1  ;;  %p1041_p10 = por %p1040_p6, %p1039_p4 }
  0x6c   : > { %p1042_p3 = pnand %p1041_p10, %p1035_p9 }
  0x6e   : > { %1045 = shalt.err (!%p1042_p3)
}
  0x6f   : > { %888 = dma.hbm_to_vmem [thread:$0]  (!%p1385_p11), %s1381_s30, 128, %s1389_s29, %s235_s10  }
  0x70   : > { %255 = sbr.rel (%p1287_p8) target bundleno = 433 (0x1b1), region = 32  ;;  %s1419_s11 = sand.u32 (!%p1287_p8), 1, %s1176_s19  }
  0x71   : > { %s1422_s15 = sshll.u32 (!%p1287_p8), %s1419_s11, 3  ;;  %s258_s17 = scalar_lea.sflag (!%p1287_p8), [#allocation3], %s1419_s11 }
  0x72   : > { %s261_s12 = scalar_lea.vmem (!%p1287_p8), [#allocation2], %s1422_s15  ;;  %p1588_p4 = scmp.ne.s32.totalorder (!%p1287_p8), %s1578_s26, 0 }
  0x77   : > { %1155 = dma.done.wait (%p1588_p4), %s258_s17, 128  }
  0x78   : > { %1157 = vsyncadd (%p1588_p4), %s258_s17, 4294967168  ;;  %p1589_p9 = scmp.eq.s32.totalorder %s1266_s24, 0 }
  0x7a   : > { %1159 = dma.done.wait (%p1589_p9), [#allocation6], 6192   ;;  %p1590_p8 = pmov %p1589_p9 }
  0x7b   : > { %v1199_v0 = vmov 0.0|0.0   ;;  %v1200_v1 = vmov 0.0   ;;  %vm1201_vm0 = vmmov 0   ;;  %v308_v2 = vld [vmem:[#allocation5 + $0x8] sm:$0xff]  ;;  %v311_v3 = vld [vmem:[#allocation5 + $0x20] sm:$0xff]  ;;  %v310_v6 = vld [vmem:[#allocation5 + $0x18] sm:$0xff] }
  0x7c   : > { %1161 = vsyncadd (%p1590_p8), [#allocation6], 4294961104  ;;  %838 = vmatprep.subr.bf16.mxu1 %v1199_v0  ;;  %436 = vmatprep.mubr.f32.mxu0 %v1200_v1  ;;  %v307_v4 = vld [vmem:[#allocation5] sm:$0xff]  ;;  %v806_v5 = vpack.c.bf16 %v311_v3, %v308_v2  ;;  %v309_v7 = vld [vmem:[#allocation5 + $0x10] sm:$0xff]  ;;  %s749_s28 = sshll.u32 %s1184_s21, 7  ;;  %s291_s30 = scalar_lea.vmem [#allocation8], %s1422_s15 }
  0x7d   : > { %803 = vmatprep.mubr.msk.f32.mxu1 %vm1201_vm0, %v1200_v1  ;;  %v312_v8 = vld [vmem:[#allocation5 + $0x28] sm:$0xff]  ;;  %v808_v9 = vpack.c.bf16 %v310_v6, %v307_v4  ;;  %v314_v11 = vld [vmem:[#allocation5 + $0x38] sm:$0xff]  ;;  %v317_v12 = vld [vmem:[#allocation5 + $0x50] sm:$0xff]  ;;  %s541_s29 = sshll.u32 %s291_s30, 4  ;;  %s305_s7 = scalar_lea.vmem [#allocation11], %s1422_s15  ;;  %s1454_s29 = int_to_ptr.vmem [resolvable:$true] %s541_s29 }
  0x7e   : > { %v839_v10 = vpack.c.bf16 %v312_v8, %v309_v7  ;;  %v313_v13 = vld [vmem:[#allocation5 + $0x30] sm:$0xff]  ;;  %807 = vmatprep.subr.bf16.mxu0 %v806_v5  ;;  %v810_v14 = vpack.c.bf16 %v317_v12, %v314_v11  ;;  %v316_v15 = vld [vmem:[#allocation5 + $0x48] sm:$0xff]  ;;  %v315_v16 = vld [vmem:[#allocation5 + $0x40] sm:$0xff]  ;;  %v357_v12 = vlaneseq  ;;  %s569_s10 = sshll.u32 %s305_s7, 4  ;;  %s298_s8 = scalar_lea.vmem [#allocation9], %s1422_s15  ;;  %s1468_s10 = int_to_ptr.vmem [resolvable:$true] %s569_s10 }
  0x7f   : > { %v318_v17 = vld [vmem:[#allocation5 + $0x58] sm:$0xff]  ;;  %809 = vmatpush1.bf16.msra.mxu0 %v808_v9  ;;  %v812_v18 = vpack.c.bf16 %v316_v15, %v313_v13  ;;  %v320_v20 = vld [vmem:[#allocation5 + $0x68] sm:$0xff]  ;;  %v323_v21 = vld [vmem:[#allocation5 + $0x80] sm:$0xff]  ;;  %s555_s13 = sshll.u32 %s298_s8, 4  ;;  %s1459_s25 = scalar_lea.hbm %s1569_s4, %s749_s28  ;;  %s1461_s13 = int_to_ptr.vmem [resolvable:$true] %s555_s13 }
  0x80   : > { %840 = vmatpush3.bf16.msra.mxu1 %v839_v10  ;;  %v842_v19 = vpack.c.bf16 %v318_v17, %v315_v16  ;;  %v319_v22 = vld [vmem:[#allocation5 + $0x60] sm:$0xff]  ;;  %811 = vmatprep.subr.bf16.mxu0 %v810_v14  ;;  %v814_v23 = vpack.c.bf16 %v323_v21, %v320_v20  ;;  %v322_v24 = vld [vmem:[#allocation5 + $0x78] sm:$0xff]  ;;  %v321_v25 = vld [vmem:[#allocation5 + $0x70] sm:$0xff]  ;;  %v358_v13 = vshrl.u32 %v357_v12, 7  ;;  %s1466_s16 = scalar_lea.hbm %s1570_s5, %s749_s28  ;;  %s517_s17 = scalar_lea.sflag [#allocation4], %s1419_s11 }
  0x81   : > { %841 = vmatprep.subr.bf16.mxu1 %v1199_v0  ;;  %v324_v26 = vld [vmem:[#allocation5 + $0x88] sm:$0xff]  ;;  %v326_v27 = vld [vmem:[#allocation5 + $0x98] sm:$0xff]  ;;  %v329_v28 = vld [vmem:[#allocation5 + $0xb0] sm:$0xff]  ;;  %v816_v29 = vpack.c.bf16 %v322_v24, %v319_v22  ;;  %s1046_s1 = scalar_lea.vmem %s1454_s29, 128  ;;  %p1591_p2 = scmp.ne.s32.totalorder %s1585_s6, 0 }
  0x82   : > { %v845_v30 = vpack.c.bf16 %v324_v26, %v321_v25  ;;  %v325_v31 = vld [vmem:[#allocation5 + $0x90] sm:$0xff]  ;;  %v818_v32 = vpack.c.bf16 %v329_v28, %v326_v27  ;;  %v328_v33 = vld [vmem:[#allocation5 + $0xa8] sm:$0xff]  ;;  %v327_v34 = vld [vmem:[#allocation5 + $0xa0] sm:$0xff]  ;;  %v359_v14 = vsub.s32 0, %v358_v13  ;;  %v367_v15 = vsub.s32 2, %v358_v13  ;;  %p1047_p11 = scmp.ne.s32.totalorder %s1454_s29, %s1046_s1  ;;  %s1202_s21 = smov [#allocation8]  }
  0x83   : > { %813 = vmatpush1.bf16.msra.mxu0 %v812_v18  ;;  %v330_v35 = vld [vmem:[#allocation5 + $0xb8] sm:$0xff]  ;;  %v332_v36 = vld [vmem:[#allocation5 + $0xc8] sm:$0xff]  ;;  %v335_v37 = vld [vmem:[#allocation5 + $0xe0] sm:$0xff]  ;;  %v820_v38 = vpack.c.bf16 %v328_v33, %v325_v31  ;;  %v363_v17 = vsub.s32 1, %v358_v13  ;;  %s1050_s15 = sshll.u32 %s1202_s21, 4  ;;  %s1051_s15 = int_to_ptr.vmem [resolvable:$false] %s1050_s15 }
  0x84   : > { %843 = vmatpush3.bf16.msra.mxu1 %v842_v19  ;;  %815 = vmatprep.subr.bf16.mxu0 %v814_v23  ;;  %v848_v39 = vpack.c.bf16 %v330_v35, %v327_v34  ;;  %v331_v40 = vld [vmem:[#allocation5 + $0xc0] sm:$0xff]  ;;  %v822_v41 = vpack.c.bf16 %v335_v37, %v332_v36  ;;  %v334_v42 = vld [vmem:[#allocation5 + $0xd8] sm:$0xff]  ;;  %v333_v43 = vld [vmem:[#allocation5 + $0xd0] sm:$0xff]  ;;  %p1048_p13 = pnand %p1047_p11, %p1591_p2  ;;  %s1052_s2 = scalar_lea.vmem %s1051_s15, 256 }
  0x85   : > { %844 = vmatprep.subr.bf16.mxu1 %v1199_v0  ;;  %v336_v44 = vld [vmem:[#allocation5 + $0xe8] sm:$0xff]  ;;  %v338_v45 = vld [vmem:[#allocation5 + $0xf8] sm:$0xff]  ;;  %v341_v46 = vld [vmem:[#allocation5 + $0x110] sm:$0xff]  ;;  %v824_v47 = vpack.c.bf16 %v334_v42, %v331_v40  ;;  %p1053_p7 = scmp.lt.s32.totalorder %s1454_s29, %s1051_s15  ;;  %p1054_p12 = scmp.lt.s32.totalorder %s1052_s2, %s1046_s1 }
  0x86   : > { %v851_v48 = vpack.c.bf16 %v336_v44, %v333_v43  ;;  %v337_v49 = vld [vmem:[#allocation5 + $0xf0] sm:$0xff]  ;;  %v826_v50 = vpack.c.bf16 %v341_v46, %v338_v45  ;;  %v340_v51 = vld [vmem:[#allocation5 + $0x108] sm:$0xff]  ;;  %v339_v52 = vld [vmem:[#allocation5 + $0x100] sm:$0xff]  ;;  %p1049_p5 = pneg %p1048_p13 }
  0x87   : > { %817 = vmatpush1.bf16.msra.mxu0 %v816_v29  ;;  %v342_v53 = vld [vmem:[#allocation5 + $0x118] sm:$0xff]  ;;  %v344_v54 = vld [vmem:[#allocation5 + $0x128] sm:$0xff]  ;;  %v347_v55 = vld [vmem:[#allocation5 + $0x140] sm:$0xff]  ;;  %v828_v56 = vpack.c.bf16 %v340_v51, %v337_v49  ;;  %p1055_p0 = por %p1054_p12, %p1053_p7 }
  0x88   : > { %846 = vmatpush3.bf16.msra.mxu1 %v845_v30  ;;  %819 = vmatprep.subr.bf16.mxu0 %v818_v32  ;;  %v854_v57 = vpack.c.bf16 %v342_v53, %v339_v52  ;;  %v343_v58 = vld [vmem:[#allocation5 + $0x120] sm:$0xff]  ;;  %v830_v59 = vpack.c.bf16 %v347_v55, %v344_v54  ;;  %v346_v60 = vld [vmem:[#allocation5 + $0x138] sm:$0xff]  ;;  %v345_v61 = vld [vmem:[#allocation5 + $0x130] sm:$0xff] }
  0x89   : > { %847 = vmatprep.subr.bf16.mxu1 %v1199_v0  ;;  %v348_v62 = vld [vmem:[#allocation5 + $0x148] sm:$0xff]  ;;  %v350_v63 = vld [vmem:[#allocation5 + $0x158] sm:$0xff]  ;;  %v353_v1 = vld [vmem:[#allocation5 + $0x170] sm:$0xff]  ;;  %v832_v2 = vpack.c.bf16 %v346_v60, %v343_v58  ;;  %p1056_p1 = pnand %p1055_p0, %p1049_p5 }
  0x8a   : > { %v857_v3 = vpack.c.bf16 %v348_v62, %v345_v61  ;;  %v349_v4 = vld [vmem:[#allocation5 + $0x150] sm:$0xff]  ;;  %v834_v5 = vpack.c.bf16 %v353_v1, %v350_v63  ;;  %v352_v6 = vld [vmem:[#allocation5 + $0x168] sm:$0xff]  ;;  %v351_v7 = vld [vmem:[#allocation5 + $0x160] sm:$0xff] }
  0x8b   : > { %821 = vmatpush1.bf16.msra.mxu0 %v820_v38  ;;  %v354_v8 = vld [vmem:[#allocation5 + $0x178] sm:$0xff]  ;;  %v836_v9 = vpack.c.bf16 %v352_v6, %v349_v4  ;;  %v355_v16 = vld [vmem:[#allocation7] sm:$0x7] }
  0x8c   : > { %849 = vmatpush3.bf16.msra.mxu1 %v848_v39  ;;  %823 = vmatprep.subr.bf16.mxu0 %v822_v41  ;;  %v860_v10 = vpack.c.bf16 %v354_v8, %v351_v7  ;;  %v306_v11 = vld [vmem:[%s261_s12] sm:$0xff]  ;;  %v360_v18 = vrot.slane %v355_v16, %v359_v14  ;;  %v368_v19 = vrot.slane %v355_v16, %v367_v15  ;;  %s1452_s12 = scalar_lea.hbm %s1568_s3, %s749_s28 }
  0x8d   : > { %850 = vmatprep.subr.bf16.mxu1 %v1199_v0 }
  0x8f   : > { %825 = vmatpush1.bf16.msra.mxu0 %v824_v47 }
  0x90   : > { %852 = vmatpush3.bf16.msra.mxu1 %v851_v48  ;;  %827 = vmatprep.subr.bf16.mxu0 %v826_v50 }
  0x91   : > { %853 = vmatprep.subr.bf16.mxu1 %v1199_v0 }
  0x93   : > { %829 = vmatpush1.bf16.msra.mxu0 %v828_v56 }
  0x94   : > { %855 = vmatpush3.bf16.msra.mxu1 %v854_v57  ;;  %831 = vmatprep.subr.bf16.mxu0 %v830_v59 }
  0x95   : > { %856 = vmatprep.subr.bf16.mxu1 %v1199_v0 }
  0x97   : > { %833 = vmatpush1.bf16.msra.mxu0 %v832_v2 }
  0x98   : > { %858 = vmatpush3.bf16.msra.mxu1 %v857_v3  ;;  %835 = vmatprep.subr.bf16.mxu0 %v834_v5 }
  0x99   : > { %859 = vmatprep.subr.bf16.mxu1 %v1199_v0  ;;  %v364_v0 = vrot.slane %v355_v16, %v363_v17 }
  0x9b   : > { %837 = vmatpush1.bf16.msra.mxu0 %v836_v9 }
  0x9c   : > { %861 = vmatpush3.bf16.msra.mxu1 %v860_v10 }
  0x9e   : > { %437 = vmatmul.mubr.f32.vlgmr.msra.gmra.mrb[0].mxu0 %v306_v11 }
  0x9f   : > { %804 = vmatmul.mubr.f32.vlgmr.msra.gmra.mrb[0].mxu1 %v306_v11 }
 0x171   : > { %v438_v20 = vpop.f32.mrb[0].mxu0 }
 0x172   : > { %v509_v21 = vpop.f32.mrb[0].mxu1  ;;  %v439_v22 = vadd.f32 %v438_v20, %v360_v18  ;;  %v440_v23 = vpop.f32.mrb[1].mxu0 }
 0x173   : > { %v510_v24 = vadd.f32 %v509_v21, %v368_v19  ;;  %v805_v25 = vpop.f32.mrb[1].mxu1  ;;  %v441_v26 = vadd.f32 %v440_v23, %v364_v0 }
 0x174   : > { %513 = vst [vmem:[%s291_s30] sm:$0xff] %v439_v22 }
 0x175   : > { %515 = vst [vmem:[%s305_s7] sm:$0xff] %v510_v24  ;;  %514 = vst [vmem:[%s298_s8] sm:$0xff] %v441_v26 }
 0x176   : > { %1059 = shalt.err (!%p1056_p1)
}
 0x177   : > { %s1060_s0 = scalar_lea.hbm %s1452_s12, 128  ;;  %s1064_s28 = scalar_lea.hbm %s1568_s3, 256 }
 0x178   : > { %p1061_p6 = scmp.ne.s32.totalorder %s1452_s12, %s1060_s0  ;;  %p1065_p4 = scmp.lt.u32.totalorder %s1452_s12, %s1568_s3 }
 0x179   : > { %p1066_p9 = scmp.lt.u32.totalorder %s1064_s28, %s1060_s0  ;;  %p1068_p11 = scmp.lt.u32.totalorder %s1060_s0, %s1452_s12 }
 0x17a   : > { %p1062_p10 = pnand %p1061_p6, %p1591_p2 }
 0x17b   : > { %p1067_p8 = por %p1066_p9, %p1065_p4 }
 0x17c   : > { %p1063_p3 = pneg %p1062_p10 }
 0x17d   : > { %p1069_p13 = por %p1068_p11, %p1067_p8 }
 0x17f   : > { %p1070_p5 = pnand %p1069_p13, %p1063_p3 }
 0x181   : > { %1073 = shalt.err (!%p1070_p5)
}
 0x182   : > { %872 = dma.vmem_to_hbm [thread:$0]  (%p1591_p2), %s1454_s29, 128, %s1452_s12, %s517_s17  }
 0x183   : > { %s1592_s1 = sand.u32 1, %s1266_s24   ;;  %s1074_s8 = scalar_lea.vmem %s1461_s13, 128 }
 0x184   : > { %s1494_s2 = scalar_lea.sflag [#allocation10], %s1592_s1  ;;  %p1075_p7 = scmp.ne.s32.totalorder %s1461_s13, %s1074_s8 }
 0x185   : > { %s1203_s21 = smov [#allocation9]  }
 0x186   : > { %p1076_p12 = pnand %p1075_p7, %p1591_p2  ;;  %s1078_s15 = sshll.u32 %s1203_s21, 4  ;;  %s1079_s15 = int_to_ptr.vmem [resolvable:$false] %s1078_s15 }
 0x187   : > { %s1080_s0 = scalar_lea.vmem %s1079_s15, 256  ;;  %p1081_p1 = scmp.lt.s32.totalorder %s1461_s13, %s1079_s15 }
 0x188   : > { %p1077_p0 = pneg %p1076_p12  ;;  %p1082_p6 = scmp.lt.s32.totalorder %s1080_s0, %s1074_s8 }
 0x18a   : > { %p1083_p10 = por %p1082_p6, %p1081_p1 }
 0x18c   : > { %p1084_p3 = pnand %p1083_p10, %p1077_p0 }
 0x18e   : > { %1087 = shalt.err (!%p1084_p3)
}
 0x18f   : > { %s1088_s24 = scalar_lea.hbm %s1459_s25, 128  ;;  %s1092_s17 = scalar_lea.hbm %s1569_s4, 256 }
 0x190   : > { %p1089_p4 = scmp.ne.s32.totalorder %s1459_s25, %s1088_s24  ;;  %p1093_p11 = scmp.lt.u32.totalorder %s1459_s25, %s1569_s4 }
 0x191   : > { %p1094_p13 = scmp.lt.u32.totalorder %s1092_s17, %s1088_s24  ;;  %p1096_p7 = scmp.lt.u32.totalorder %s1088_s24, %s1459_s25 }
 0x192   : > { %p1090_p9 = pnand %p1089_p4, %p1591_p2 }
 0x193   : > { %p1095_p5 = por %p1094_p13, %p1093_p11 }
 0x194   : > { %p1091_p8 = pneg %p1090_p9 }
 0x195   : > { %p1097_p12 = por %p1096_p7, %p1095_p5 }
 0x197   : > { %p1098_p0 = pnand %p1097_p12, %p1091_p8 }
 0x199   : > { %1101 = shalt.err (!%p1098_p0)
}
 0x19a   : > { %873 = dma.vmem_to_hbm [thread:$0]  (%p1591_p2), %s1461_s13, 128, %s1459_s25, %s1494_s2  }
 0x19b   : > { %s1102_s28 = scalar_lea.vmem %s1468_s10, 128  ;;  %s1204_s30 = smov [#allocation11]  }
 0x19c   : > { %p1103_p1 = scmp.ne.s32.totalorder %s1468_s10, %s1102_s28  ;;  %s1106_s7 = sshll.u32 %s1204_s30, 4  ;;  %s1107_s7 = int_to_ptr.vmem [resolvable:$false] %s1106_s7 }
 0x19d   : > { %s1108_s1 = scalar_lea.vmem %s1107_s7, 256  ;;  %p1109_p3 = scmp.lt.s32.totalorder %s1468_s10, %s1107_s7 }
 0x19e   : > { %p1104_p6 = pnand %p1103_p1, %p1591_p2  ;;  %p1110_p4 = scmp.lt.s32.totalorder %s1108_s1, %s1102_s28 }
 0x1a0   : > { %p1105_p10 = pneg %p1104_p6  ;;  %p1111_p9 = por %p1110_p4, %p1109_p3 }
 0x1a2   : > { %p1112_p8 = pnand %p1111_p9, %p1105_p10 }
 0x1a4   : > { %1115 = shalt.err (!%p1112_p8)
}
 0x1a5   : > { %s1116_s25 = scalar_lea.hbm %s1466_s16, 128  ;;  %s1120_s21 = scalar_lea.hbm %s1570_s5, 256 }
 0x1a6   : > { %p1117_p11 = scmp.ne.s32.totalorder %s1466_s16, %s1116_s25  ;;  %p1121_p7 = scmp.lt.u32.totalorder %s1466_s16, %s1570_s5 }
 0x1a7   : > { %p1122_p12 = scmp.lt.u32.totalorder %s1120_s21, %s1116_s25  ;;  %p1124_p1 = scmp.lt.u32.totalorder %s1116_s25, %s1466_s16 }
 0x1a8   : > { %p1118_p13 = pnand %p1117_p11, %p1591_p2 }
 0x1a9   : > { %p1123_p0 = por %p1122_p12, %p1121_p7 }
 0x1aa   : > { %p1119_p5 = pneg %p1118_p13 }
 0x1ab   : > { %p1125_p6 = por %p1124_p1, %p1123_p0 }
 0x1ad   : > { %p1126_p10 = pnand %p1125_p6, %p1119_p5 }
 0x1af   : > { %1129 = shalt.err (!%p1126_p10)
}
 0x1b0   : > { %874 = dma.vmem_to_hbm [thread:$0]  (%p1591_p2), %s1468_s10, 128, %s1466_s16, %s1494_s2  }
 0x1b1 PF: > { %s581_s24 = sand.u32 1, %s1172_s18   ;;  %p1593_p3 = scmp.ne.s32.totalorder %s1579_s27, 0 }
 0x1b2   : > { %p1594_p4 = scmp.ge.s32.totalorder %s1192_s23, 2  ;;  %s582_s29 = scalar_lea.sflag [#allocation4], %s581_s24 }
 0x1b4   : > { %p890_p9 = pnand %p1594_p4, %p1593_p3 }
 0x1b6   : > { %1163 = dma.done.wait (!%p890_p9), %s582_s29, 128  }
 0x1b7   : > { %1165 = vsyncadd (!%p890_p9), %s582_s29, 4294967168  ;;  %s1595_s12 = sadd.s32 4294967294, %s1192_s23  }
 0x1b8   : > { %s590_s17 = sand.u32 1, %s1595_s12  }
 0x1b9   : > { %s591_s11 = scalar_lea.sflag [#allocation10], %s590_s17 }
 0x1ba   : > { %1167 = dma.done.wait (!%p890_p9), %s591_s11, 256  }
 0x1bb   : > { %1169 = vsyncadd (!%p890_p9), %s591_s11, 4294967040  ;;  %s26_s23 = sadd.s32 1, %s1192_s23   ;;  %s1596_s18 = smov %s1176_s19 }
 0x1bc   : > { %p23_p2 = scmp.ge.s32.totalorder %s26_s23, 4   ;;  %s1597_s19 = smov %s1180_s20 }
 0x1bd   : > { %s1598_s20 = smov %s1376_s14  ;;  %s1599_s21 = smov %s1188_s22 }
 0x1be   : > { %s1600_s22 = smov %s1602_s9  ;;  %25 = sbr.rel (!%p23_p2) target bundleno = 13 (0xd), region = 117 }
 0x1c5   :  { %605 = vsyncpa [#allocation3], 1 }
 0x1c6   :  { %607 = vsyncpa [#allocation3 + $0x1], 1 }
 0x1c7   :  { %608 = vsyncpa [#allocation6], 1 }
 0x1c8   :  { %609 = vsyncpa [#allocation4], 1 }
 0x1c9   :  { %611 = vsyncpa [#allocation4 + $0x1], 1 }
 0x1ca   :  { %612 = vsyncpa [#allocation10], 1 }
 0x1cb   :  { %614 = vsyncpa [#allocation10 + $0x1], 1 }

</bundles_post_ra>
